<compile_context>
chip_gen: v7x
topology: tpu7x:2x2x1
jax: 0.10.0
libtpu: 0.0.40
codegen_flags: <defaults>
</compile_context>

<pallas_src>
import numpy as np
import jax
import jax.numpy as jnp
from jax.experimental import pallas as pl
from jax.experimental.pallas import tpu as pltpu

NUM_CLASSES = 7
IGNORE_LABEL = 8
NEG = -1.0e30          # "minus infinity" pad for the 8th class row (finite: 0*NEG != NaN)
PACK_W = 128

# ---- layout of the packed (8, 128) output block --------------------------- #
# lanes 0..2 of rows 0..6 : per-class histograms (pred / correct / total)
# row 0, lanes 8..14      : scalar stats
HIST_PRED_LANE, HIST_CORR_LANE, HIST_TOT_LANE = 0, 1, 2
L_LDL, L_UDL, L_SENT, L_COUNT, L_CORRECT, L_TRAIN, L_EVAL = 8, 9, 10, 11, 12, 13, 14


def _bucket(n, minimum=128):
    """Next power of two, at least `minimum` — fixed shape buckets (no retrace)."""
    return max(minimum, 1 << (int(n) - 1).bit_length())


# ------------------------------ Pallas kernel ------------------------------ #
def _fused_message_loss_kernel(params_ref, ld_ref, ud_ref, logits_ref, tgt_ref,
                               out_ref):
    # scalar hyper-params / static inverse counts from SMEM
    w1 = params_ref[0]
    w2 = params_ref[1]
    inv_b1 = params_ref[2]
    inv_b2 = params_ref[3]

    # ---------------- doc-level MSE losses (zero-padded => pads contribute 0) ----
    ld = ld_ref[...]                                   # [2, B1p]  (pred row, target row)
    d1 = ld[0:1, :] - ld[1:2, :]
    ldl = jnp.sum(d1 * d1) * inv_b1

    ud = ud_ref[...]                                   # [2, B2p]
    d2 = ud[0:1, :] - ud[1:2, :]
    udl = jnp.sum(d2 * d2) * inv_b2

    # ---------------- sentence CE + stats (class on sublane, lane-dense) --------
    logits = logits_ref[...]                           # [8, Np] f32, row 7 == NEG
    tgt = tgt_ref[...]                                 # [1, Np] int32 (pads == 8)
    C8, Np = logits.shape
    cls = jax.lax.broadcasted_iota(jnp.int32, (C8, Np), 0)     # sublane index

    m = jnp.max(logits, axis=0, keepdims=True)         # [1, Np]   (sublane reduce)
    shifted = logits - m                               # [8, Np]
    lse = jnp.log(jnp.sum(jnp.exp(shifted), axis=0, keepdims=True))   # [1, Np]

    valid = tgt != IGNORE_LABEL                        # [1, Np] bool
    validf = valid.astype(jnp.float32)

    tgt_onehot = (cls == tgt).astype(jnp.float32)      # [8, Np]
    tgt_shift = jnp.sum(tgt_onehot * shifted, axis=0, keepdims=True)  # [1, Np]
    nll = (lse - tgt_shift) * validf                   # -log p[target], masked
    loss_sum = jnp.sum(nll)
    count = jnp.sum(validf)
    # loss_sum is exactly 0 when count == 0, so the max() guard is exact
    sent_loss = loss_sum / jnp.maximum(count, 1.0)

    # first-occurrence argmax along classes (row 7 is NEG => never selected)
    pred = jnp.min(jnp.where(logits == m, cls, C8), axis=0, keepdims=True)   # [1, Np]
    correct_row = jnp.logical_and(pred == tgt, valid).astype(jnp.float32)    # [1, Np]
    correct = jnp.sum(correct_row)
    pred_onehot = (cls == pred).astype(jnp.float32)    # [8, Np]

    # per-class histograms: lane reduce => [8, 1] columns (no scatter needed)
    pred_hist = jnp.sum(pred_onehot * validf, axis=1, keepdims=True)
    corr_hist = jnp.sum(tgt_onehot * correct_row, axis=1, keepdims=True)
    tot_hist = jnp.sum(tgt_onehot * validf, axis=1, keepdims=True)

    # in-kernel loss weighting
    train_loss = w1 * ldl + (1.0 - w1) * udl + w2 * sent_loss
    eval_loss = ldl + w2 * sent_loss

    # ---------------- pack everything into ONE (8, 128) vreg, one unmasked vst --
    lane = jax.lax.broadcasted_iota(jnp.int32, (C8, PACK_W), 1)
    sub = jax.lax.broadcasted_iota(jnp.int32, (C8, PACK_W), 0)
    row0 = sub == 0

    packed = (jnp.where(lane == HIST_PRED_LANE, pred_hist, 0.0)
              + jnp.where(lane == HIST_CORR_LANE, corr_hist, 0.0)
              + jnp.where(lane == HIST_TOT_LANE, tot_hist, 0.0)
              + jnp.where(row0 & (lane == L_LDL), ldl, 0.0)
              + jnp.where(row0 & (lane == L_UDL), udl, 0.0)
              + jnp.where(row0 & (lane == L_SENT), sent_loss, 0.0)
              + jnp.where(row0 & (lane == L_COUNT), count, 0.0)
              + jnp.where(row0 & (lane == L_CORRECT), correct, 0.0)
              + jnp.where(row0 & (lane == L_TRAIN), train_loss, 0.0)
              + jnp.where(row0 & (lane == L_EVAL), eval_loss, 0.0))
    out_ref[...] = packed


# ---------------- single fused dispatch: prep + pallas_call ----------------- #
@jax.jit
def _fused_forward(w1, w2, labeled_doc, target1, unlabeled_doc, target3,
                   labeled_sent, target2):
    # ---- doc pairs: (pred row, target row), zero-padded to a lane bucket ----
    ld = labeled_doc.astype(jnp.float32).reshape(1, -1)
    t1 = target1.astype(jnp.float32).reshape(1, -1)
    b1 = ld.shape[1]
    b1p = _bucket(b1)
    ld_pair = jnp.pad(jnp.concatenate([ld, t1], axis=0), ((0, 0), (0, b1p - b1)))

    ud = unlabeled_doc.astype(jnp.float32).reshape(1, -1)
    t3 = target3.astype(jnp.float32).reshape(1, -1)
    b2 = ud.shape[1]
    b2p = _bucket(b2)
    ud_pair = jnp.pad(jnp.concatenate([ud, t3], axis=0), ((0, 0), (0, b2p - b2)))

    # ---- sentence logits: class-on-sublane [8, Npad], row 7 / pad cols = NEG ----
    logits = labeled_sent.astype(jnp.float32)                      # [N, 7]
    n0 = logits.shape[0]
    n_pad = _bucket(n0)
    logits_t = jnp.pad(jnp.transpose(logits),                      # [7, N] -> [8, Npad]
                       ((0, 1), (0, n_pad - n0)), constant_values=NEG)

    tgt = target2.reshape(1, -1).astype(jnp.int32)                 # [1, N]
    tgt = jnp.pad(tgt, ((0, 0), (0, n_pad - n0)), constant_values=IGNORE_LABEL)

    # w1/w2 (dynamic) + inverse element counts (static, trace-time) in SMEM
    params = jnp.stack([jnp.asarray(w1, jnp.float32),
                        jnp.asarray(w2, jnp.float32),
                        jnp.float32(1.0 / b1),
                        jnp.float32(1.0 / b2)])

    packed = pl.pallas_call(
        _fused_message_loss_kernel,
        out_shape=jax.ShapeDtypeStruct((8, PACK_W), jnp.float32),
        in_specs=[
            pl.BlockSpec(memory_space=pltpu.MemorySpace.SMEM),     # [w1, w2, 1/b1, 1/b2]
            pl.BlockSpec(memory_space=pltpu.MemorySpace.VMEM),     # labeled-doc pair
            pl.BlockSpec(memory_space=pltpu.MemorySpace.VMEM),     # unlabeled-doc pair
            pl.BlockSpec(memory_space=pltpu.MemorySpace.VMEM),     # logits [8, Npad]
            pl.BlockSpec(memory_space=pltpu.MemorySpace.VMEM),     # targets [1, Npad]
        ],
        out_specs=pl.BlockSpec(memory_space=pltpu.MemorySpace.VMEM),
    )(params, ld_pair, ud_pair, logits_t, tgt)

    # device-resident loss scalars, split inside the same jit (no extra dispatch)
    return packed, packed[0, L_TRAIN], packed[0, L_EVAL], packed[0, L_SENT]


# ------------------------------- MessageLoss -------------------------------- #
class MessageLoss:
    def __init__(self, w1=1, w2=10):
        self.w1 = w1
        self.w2 = w2

    def forward(self, labeled_doc=None, target1=None, labeled_sent=None,
                target2=None, w1=None, unlabeled_doc=None, target3=None,
                mode='None'):
        if w1 is not None:
            self.w1 = w1

        # absent inputs -> tiny zero placeholders (contribute exactly 0 / empty)
        if labeled_doc is not None:
            ld = jnp.asarray(labeled_doc, jnp.float32)
            t1 = jnp.asarray(target1, jnp.float32)
        else:
            ld = jnp.zeros((1, 1), jnp.float32)
            t1 = jnp.zeros((1,), jnp.float32)

        if unlabeled_doc is not None:
            ud = jnp.asarray(unlabeled_doc, jnp.float32)
            t3 = jnp.asarray(target3, jnp.float32)
        else:
            ud = jnp.zeros((1, 1), jnp.float32)
            t3 = jnp.zeros((1,), jnp.float32)

        if target2 is not None:
            sent = jnp.asarray(labeled_sent, jnp.float32)
            t2 = jnp.asarray(target2, jnp.int32)
        else:
            sent = jnp.zeros((1, NUM_CLASSES), jnp.float32)
            t2 = jnp.full((1,), IGNORE_LABEL, jnp.int32)

        # ---- ONE fused dispatch (prep + kernel) ----
        packed, loss_train, loss_eval, labeled_sent_loss = _fused_forward(
            float(self.w1), float(self.w2), ld, t1, ud, t3, sent, t2)

        # Start the device->host copy of the stats block immediately so the
        # (API-mandated) host read below overlaps with the transfer instead of
        # serializing launch -> idle -> blocking copy.  The loss scalars above
        # stay device-resident and need no host sync to be consumed downstream.
        packed.copy_to_host_async()
        stats = np.asarray(packed)                      # completes the async copy

        count = int(round(float(stats[0, L_COUNT])))
        correct = int(round(float(stats[0, L_CORRECT])))
        predict_dict = {c: int(round(float(stats[c, HIST_PRED_LANE]))) for c in range(NUM_CLASSES)}
        correct_dict = {c: int(round(float(stats[c, HIST_CORR_LANE]))) for c in range(NUM_CLASSES)}
        correct_total = {c: int(round(float(stats[c, HIST_TOT_LANE]))) for c in range(NUM_CLASSES)}

        p = 0.0
        r = 0.0
        if mode != 'train':
            for u, v in correct_dict.items():
                p += 0.0 if predict_dict[u] == 0 else v / predict_dict[u]
                # NOTE: original torch code divides unconditionally here and
                # would raise on a class with zero true examples; we guard.
                r += 0.0 if correct_total[u] == 0 else v / correct_total[u]

        if mode == 'train':
            return (loss_train, labeled_sent_loss, correct_dict, predict_dict,
                    correct_total, correct, count, p / 7, r / 7)
        else:
            return (loss_eval, float(np.sqrt(stats[0, L_LDL])), labeled_sent_loss,
                    correct_dict, predict_dict, correct_total, correct, count,
                    p / 7, r / 7)


# ------------------------------- reference ---------------------------------- #
def _ref_losses(labeled_doc, target1, labeled_sent, target2,
                unlabeled_doc, target3, w1, w2):
    ld = np.asarray(labeled_doc).squeeze(1)
    doc_loss = np.mean((ld - np.asarray(target1)) ** 2)
    ud = np.asarray(unlabeled_doc).squeeze(1)
    un_loss = np.mean((ud - np.asarray(target3)) ** 2)
    logits = np.asarray(labeled_sent, np.float64)
    t2 = np.asarray(target2).reshape(-1)
    m = logits.max(axis=1, keepdims=True)
    e = np.exp(logits - m)
    logp = logits - m - np.log(e.sum(axis=1, keepdims=True))
    pred = logits.argmax(axis=1)
    count = 0
    correct = 0
    sent_loss = 0.0
    pred_d = {c: 0 for c in range(NUM_CLASSES)}
    corr_d = {c: 0 for c in range(NUM_CLASSES)}
    tot_d = {c: 0 for c in range(NUM_CLASSES)}
    for i in range(t2.shape[0]):
        if t2[i] == IGNORE_LABEL:
            continue
        count += 1
        tot_d[int(t2[i])] += 1
        pred_d[int(pred[i])] += 1
        if pred[i] == t2[i]:
            correct += 1
            corr_d[int(t2[i])] += 1
        sent_loss += -logp[i][t2[i]]
    if count != 0:
        sent_loss /= count
    train_loss = w1 * doc_loss + (1 - w1) * un_loss + w2 * sent_loss
    eval_loss = doc_loss + w2 * sent_loss
    return train_loss, eval_loss, correct, count, pred_d, corr_d, tot_d


# ---------------------------------- main ------------------------------------ #
if __name__ == "__main__":
    key = jax.random.PRNGKey(0)
    B, S = 4, 8
    N = B * S

    k1, k2, k3, k4, k5 = jax.random.split(key, 5)
    labeled_doc = jax.random.normal(k1, (B, 1), jnp.float32)
    target1 = jax.random.normal(k2, (B,), jnp.float32)
    unlabeled_doc = jax.random.normal(k3, (B, 1), jnp.float32)
    target3 = jax.random.normal(k4, (B,), jnp.float32)
    labeled_sent = jax.random.normal(k5, (N, NUM_CLASSES), jnp.float32)

    # deterministic sentence labels covering all classes 0..6 plus ignore (8)
    t2_np = (np.arange(N) % 8).astype(np.int32)
    t2_np[t2_np == 7] = IGNORE_LABEL
    target2 = jnp.asarray(t2_np.reshape(B, S))

    w1, w2 = 0.7, 10.0
    crit = MessageLoss(w1=w1, w2=w2)

    train_out = crit.forward(labeled_doc=labeled_doc, target1=target1,
                             labeled_sent=labeled_sent, target2=target2,
                             w1=w1, unlabeled_doc=unlabeled_doc,
                             target3=target3, mode='train')
    eval_out = crit.forward(labeled_doc=labeled_doc, target1=target1,
                            labeled_sent=labeled_sent, target2=target2,
                            w1=w1, unlabeled_doc=unlabeled_doc,
                            target3=target3, mode='eval')
    jax.block_until_ready(train_out[0])
    jax.block_until_ready(eval_out[0])

    (ref_train, ref_eval, ref_correct, ref_count,
     ref_pred, ref_corr, ref_tot) = _ref_losses(
        labeled_doc, target1, labeled_sent, target2,
        unlabeled_doc, target3, w1, w2)

    assert np.allclose(float(train_out[0]), ref_train, rtol=1e-4, atol=1e-4)
    assert np.allclose(float(eval_out[0]), ref_eval, rtol=1e-4, atol=1e-4)
    assert train_out[5] == ref_correct and train_out[6] == ref_count
    assert train_out[3] == ref_pred          # predict_dict
    assert train_out[2] == ref_corr          # correct_dict
    assert train_out[4] == ref_tot           # correct_total

    print("KERNEL_OK")
</pallas_src>

<mosaic_0001>
module attributes {stable_mosaic.version = 11 : i64} {
  func.func @_fused_message_loss_kernel(%arg0: memref<4xf32, #tpu.memory_space<smem>>, %arg1: memref<2x128xf32, #tpu.memory_space<vmem>>, %arg2: memref<2x128xf32, #tpu.memory_space<vmem>>, %arg3: memref<8x128xf32, #tpu.memory_space<vmem>>, %arg4: memref<1x128xi32, #tpu.memory_space<vmem>>, %arg5: memref<8x128xf32, #tpu.memory_space<vmem>>) attributes {dimension_semantics = [], scalar_prefetch = 0 : i64, scratch_operands = 0 : i64, tpu.core_type = #tpu.core_type<tc>} {
    %c0 = arith.constant 0 : index
    %0 = memref.load %arg0[%c0] : memref<4xf32, #tpu.memory_space<smem>>
    %c1 = arith.constant 1 : index
    %1 = memref.load %arg0[%c1] : memref<4xf32, #tpu.memory_space<smem>>
    %c2 = arith.constant 2 : index
    %2 = memref.load %arg0[%c2] : memref<4xf32, #tpu.memory_space<smem>>
    %c3 = arith.constant 3 : index
    %3 = memref.load %arg0[%c3] : memref<4xf32, #tpu.memory_space<smem>>
    %c0_0 = arith.constant 0 : index
    %c0_1 = arith.constant 0 : index
    %4 = vector.load %arg1[%c0_0, %c0_1] : memref<2x128xf32, #tpu.memory_space<vmem>>, vector<2x128xf32>
    %5 = vector.extract_strided_slice %4 {offsets = [0, 0], sizes = [1, 128], strides = [1, 1]} : vector<2x128xf32> to vector<1x128xf32>
    %6 = vector.extract_strided_slice %4 {offsets = [1, 0], sizes = [1, 128], strides = [1, 1]} : vector<2x128xf32> to vector<1x128xf32>
    %7 = arith.subf %5, %6 : vector<1x128xf32>
    %8 = arith.mulf %7, %7 : vector<1x128xf32>
    %9 = vector.shape_cast %8 : vector<1x128xf32> to vector<1x1x128xf32>
    %cst = arith.constant dense<0.000000e+00> : vector<1xf32>
    %10 = vector.multi_reduction <add>, %9, %cst [1, 2] : vector<1x1x128xf32> to vector<1xf32>
    %11 = vector.shape_cast %10 : vector<1xf32> to vector<1x1x1xf32>
    %12 = vector.extract %11[0, 0, 0] : f32 from vector<1x1x1xf32>
    %13 = arith.mulf %12, %2 : f32
    %c0_2 = arith.constant 0 : index
    %c0_3 = arith.constant 0 : index
    %14 = vector.load %arg2[%c0_2, %c0_3] : memref<2x128xf32, #tpu.memory_space<vmem>>, vector<2x128xf32>
    %15 = vector.extract_strided_slice %14 {offsets = [0, 0], sizes = [1, 128], strides = [1, 1]} : vector<2x128xf32> to vector<1x128xf32>
    %16 = vector.extract_strided_slice %14 {offsets = [1, 0], sizes = [1, 128], strides = [1, 1]} : vector<2x128xf32> to vector<1x128xf32>
    %17 = arith.subf %15, %16 : vector<1x128xf32>
    %18 = arith.mulf %17, %17 : vector<1x128xf32>
    %19 = vector.shape_cast %18 : vector<1x128xf32> to vector<1x1x128xf32>
    %cst_4 = arith.constant dense<0.000000e+00> : vector<1xf32>
    %20 = vector.multi_reduction <add>, %19, %cst_4 [1, 2] : vector<1x1x128xf32> to vector<1xf32>
    %21 = vector.shape_cast %20 : vector<1xf32> to vector<1x1x1xf32>
    %22 = vector.extract %21[0, 0, 0] : f32 from vector<1x1x1xf32>
    %23 = arith.mulf %22, %3 : f32
    %c0_5 = arith.constant 0 : index
    %c0_6 = arith.constant 0 : index
    %24 = vector.load %arg3[%c0_5, %c0_6] : memref<8x128xf32, #tpu.memory_space<vmem>>, vector<8x128xf32>
    %c0_7 = arith.constant 0 : index
    %c0_8 = arith.constant 0 : index
    %25 = vector.load %arg4[%c0_7, %c0_8] : memref<1x128xi32, #tpu.memory_space<vmem>>, vector<1x128xi32>
    %26 = tpu.iota {dimensions = array<i32: 0>} : vector<8x128xi32>
    %cst_9 = arith.constant dense<0xFF800000> : vector<128xf32>
    %27 = vector.multi_reduction <maximumf>, %24, %cst_9 [0] : vector<8x128xf32> to vector<128xf32>
    %28 = vector.shape_cast %27 : vector<128xf32> to vector<1x128xf32>
    %29 = vector.broadcast %28 : vector<1x128xf32> to vector<8x128xf32>
    %30 = arith.subf %24, %29 : vector<8x128xf32>
    %31 = math.exp %30 : vector<8x128xf32>
    %cst_10 = arith.constant dense<0.000000e+00> : vector<128xf32>
    %32 = vector.multi_reduction <add>, %31, %cst_10 [0] : vector<8x128xf32> to vector<128xf32>
    %33 = vector.shape_cast %32 : vector<128xf32> to vector<1x128xf32>
    %34 = math.log %33 : vector<1x128xf32>
    %c8_i32 = arith.constant 8 : i32
    %35 = vector.broadcast %c8_i32 : i32 to vector<1x128xi32>
    %36 = arith.cmpi ne, %25, %35 : vector<1x128xi32>
    %37 = arith.extui %36 : vector<1x128xi1> to vector<1x128xi32>
    %38 = arith.sitofp %37 : vector<1x128xi32> to vector<1x128xf32>
    %39 = vector.broadcast %25 : vector<1x128xi32> to vector<8x128xi32>
    %40 = arith.cmpi eq, %26, %39 : vector<8x128xi32>
    %41 = arith.extui %40 : vector<8x128xi1> to vector<8x128xi32>
    %42 = arith.sitofp %41 : vector<8x128xi32> to vector<8x128xf32>
    %43 = arith.mulf %42, %30 : vector<8x128xf32>
    %cst_11 = arith.constant dense<0.000000e+00> : vector<128xf32>
    %44 = vector.multi_reduction <add>, %43, %cst_11 [0] : vector<8x128xf32> to vector<128xf32>
    %45 = vector.shape_cast %44 : vector<128xf32> to vector<1x128xf32>
    %46 = arith.subf %34, %45 : vector<1x128xf32>
    %47 = arith.mulf %46, %38 : vector<1x128xf32>
    %48 = vector.shape_cast %47 : vector<1x128xf32> to vector<1x1x128xf32>
    %cst_12 = arith.constant dense<0.000000e+00> : vector<1xf32>
    %49 = vector.multi_reduction <add>, %48, %cst_12 [1, 2] : vector<1x1x128xf32> to vector<1xf32>
    %50 = vector.shape_cast %49 : vector<1xf32> to vector<1x1x1xf32>
    %51 = vector.extract %50[0, 0, 0] : f32 from vector<1x1x1xf32>
    %52 = vector.shape_cast %38 : vector<1x128xf32> to vector<1x1x128xf32>
    %cst_13 = arith.constant dense<0.000000e+00> : vector<1xf32>
    %53 = vector.multi_reduction <add>, %52, %cst_13 [1, 2] : vector<1x1x128xf32> to vector<1xf32>
    %54 = vector.shape_cast %53 : vector<1xf32> to vector<1x1x1xf32>
    %55 = vector.extract %54[0, 0, 0] : f32 from vector<1x1x1xf32>
    %cst_14 = arith.constant 1.000000e+00 : f32
    %56 = arith.maximumf %55, %cst_14 : f32
    %57 = arith.divf %51, %56 : f32
    %58 = vector.broadcast %28 : vector<1x128xf32> to vector<8x128xf32>
    %59 = arith.cmpf oeq, %24, %58 : vector<8x128xf32>
    %c8_i32_15 = arith.constant 8 : i32
    %60 = vector.broadcast %c8_i32_15 : i32 to vector<8x128xi32>
    %61 = arith.select %59, %26, %60 : vector<8x128xi1>, vector<8x128xi32>
    %cst_16 = arith.constant dense<2147483647> : vector<128xi32>
    %62 = vector.multi_reduction <minsi>, %61, %cst_16 [0] : vector<8x128xi32> to vector<128xi32>
    %63 = vector.shape_cast %62 : vector<128xi32> to vector<1x128xi32>
    %64 = arith.cmpi eq, %63, %25 : vector<1x128xi32>
    %65 = arith.andi %64, %36 : vector<1x128xi1>
    %66 = arith.extui %65 : vector<1x128xi1> to vector<1x128xi32>
    %67 = arith.sitofp %66 : vector<1x128xi32> to vector<1x128xf32>
    %68 = vector.shape_cast %67 : vector<1x128xf32> to vector<1x1x128xf32>
    %cst_17 = arith.constant dense<0.000000e+00> : vector<1xf32>
    %69 = vector.multi_reduction <add>, %68, %cst_17 [1, 2] : vector<1x1x128xf32> to vector<1xf32>
    %70 = vector.shape_cast %69 : vector<1xf32> to vector<1x1x1xf32>
    %71 = vector.extract %70[0, 0, 0] : f32 from vector<1x1x1xf32>
    %72 = vector.broadcast %63 : vector<1x128xi32> to vector<8x128xi32>
    %73 = arith.cmpi eq, %26, %72 : vector<8x128xi32>
    %74 = arith.extui %73 : vector<8x128xi1> to vector<8x128xi32>
    %75 = arith.sitofp %74 : vector<8x128xi32> to vector<8x128xf32>
    %76 = vector.broadcast %38 : vector<1x128xf32> to vector<8x128xf32>
    %77 = arith.mulf %75, %76 : vector<8x128xf32>
    %cst_18 = arith.constant dense<0.000000e+00> : vector<8xf32>
    %78 = vector.multi_reduction <add>, %77, %cst_18 [1] : vector<8x128xf32> to vector<8xf32>
    %79 = vector.shape_cast %78 : vector<8xf32> to vector<8x1xf32>
    %80 = vector.broadcast %67 : vector<1x128xf32> to vector<8x128xf32>
    %81 = arith.mulf %42, %80 : vector<8x128xf32>
    %cst_19 = arith.constant dense<0.000000e+00> : vector<8xf32>
    %82 = vector.multi_reduction <add>, %81, %cst_19 [1] : vector<8x128xf32> to vector<8xf32>
    %83 = vector.shape_cast %82 : vector<8xf32> to vector<8x1xf32>
    %84 = vector.broadcast %38 : vector<1x128xf32> to vector<8x128xf32>
    %85 = arith.mulf %42, %84 : vector<8x128xf32>
    %cst_20 = arith.constant dense<0.000000e+00> : vector<8xf32>
    %86 = vector.multi_reduction <add>, %85, %cst_20 [1] : vector<8x128xf32> to vector<8xf32>
    %87 = vector.shape_cast %86 : vector<8xf32> to vector<8x1xf32>
    %88 = arith.mulf %0, %13 : f32
    %cst_21 = arith.constant 1.000000e+00 : f32
    %89 = arith.subf %cst_21, %0 : f32
    %90 = arith.mulf %89, %23 : f32
    %91 = arith.addf %88, %90 : f32
    %92 = arith.mulf %1, %57 : f32
    %93 = arith.addf %91, %92 : f32
    %94 = arith.mulf %1, %57 : f32
    %95 = arith.addf %13, %94 : f32
    %96 = tpu.iota {dimensions = array<i32: 1>} : vector<8x128xi32>
    %97 = tpu.iota {dimensions = array<i32: 0>} : vector<8x128xi32>
    %c0_i32 = arith.constant 0 : i32
    %98 = vector.broadcast %c0_i32 : i32 to vector<8x128xi32>
    %99 = arith.cmpi eq, %97, %98 : vector<8x128xi32>
    %c0_i32_22 = arith.constant 0 : i32
    %100 = vector.broadcast %c0_i32_22 : i32 to vector<8x128xi32>
    %101 = arith.cmpi eq, %96, %100 : vector<8x128xi32>
    %cst_23 = arith.constant 0.000000e+00 : f32
    %102 = vector.shape_cast %79 : vector<8x1xf32> to vector<8x1xf32>
    %103 = vector.broadcast %102 : vector<8x1xf32> to vector<8x128xf32>
    %104 = vector.broadcast %cst_23 : f32 to vector<8x128xf32>
    %105 = arith.select %101, %103, %104 : vector<8x128xi1>, vector<8x128xf32>
    %c1_i32 = arith.constant 1 : i32
    %106 = vector.broadcast %c1_i32 : i32 to vector<8x128xi32>
    %107 = arith.cmpi eq, %96, %106 : vector<8x128xi32>
    %cst_24 = arith.constant 0.000000e+00 : f32
    %108 = vector.shape_cast %83 : vector<8x1xf32> to vector<8x1xf32>
    %109 = vector.broadcast %108 : vector<8x1xf32> to vector<8x128xf32>
    %110 = vector.broadcast %cst_24 : f32 to vector<8x128xf32>
    %111 = arith.select %107, %109, %110 : vector<8x128xi1>, vector<8x128xf32>
    %112 = arith.addf %105, %111 : vector<8x128xf32>
    %c2_i32 = arith.constant 2 : i32
    %113 = vector.broadcast %c2_i32 : i32 to vector<8x128xi32>
    %114 = arith.cmpi eq, %96, %113 : vector<8x128xi32>
    %cst_25 = arith.constant 0.000000e+00 : f32
    %115 = vector.shape_cast %87 : vector<8x1xf32> to vector<8x1xf32>
    %116 = vector.broadcast %115 : vector<8x1xf32> to vector<8x128xf32>
    %117 = vector.broadcast %cst_25 : f32 to vector<8x128xf32>
    %118 = arith.select %114, %116, %117 : vector<8x128xi1>, vector<8x128xf32>
    %119 = arith.addf %112, %118 : vector<8x128xf32>
    %c8_i32_26 = arith.constant 8 : i32
    %120 = vector.broadcast %c8_i32_26 : i32 to vector<8x128xi32>
    %121 = arith.cmpi eq, %96, %120 : vector<8x128xi32>
    %122 = arith.andi %99, %121 : vector<8x128xi1>
    %cst_27 = arith.constant 0.000000e+00 : f32
    %123 = vector.broadcast %13 : f32 to vector<8x128xf32>
    %124 = vector.broadcast %cst_27 : f32 to vector<8x128xf32>
    %125 = arith.select %122, %123, %124 : vector<8x128xi1>, vector<8x128xf32>
    %126 = arith.addf %119, %125 : vector<8x128xf32>
    %c9_i32 = arith.constant 9 : i32
    %127 = vector.broadcast %c9_i32 : i32 to vector<8x128xi32>
    %128 = arith.cmpi eq, %96, %127 : vector<8x128xi32>
    %129 = arith.andi %99, %128 : vector<8x128xi1>
    %cst_28 = arith.constant 0.000000e+00 : f32
    %130 = vector.broadcast %23 : f32 to vector<8x128xf32>
    %131 = vector.broadcast %cst_28 : f32 to vector<8x128xf32>
    %132 = arith.select %129, %130, %131 : vector<8x128xi1>, vector<8x128xf32>
    %133 = arith.addf %126, %132 : vector<8x128xf32>
    %c10_i32 = arith.constant 10 : i32
    %134 = vector.broadcast %c10_i32 : i32 to vector<8x128xi32>
    %135 = arith.cmpi eq, %96, %134 : vector<8x128xi32>
    %136 = arith.andi %99, %135 : vector<8x128xi1>
    %cst_29 = arith.constant 0.000000e+00 : f32
    %137 = vector.broadcast %57 : f32 to vector<8x128xf32>
    %138 = vector.broadcast %cst_29 : f32 to vector<8x128xf32>
    %139 = arith.select %136, %137, %138 : vector<8x128xi1>, vector<8x128xf32>
    %140 = arith.addf %133, %139 : vector<8x128xf32>
    %c11_i32 = arith.constant 11 : i32
    %141 = vector.broadcast %c11_i32 : i32 to vector<8x128xi32>
    %142 = arith.cmpi eq, %96, %141 : vector<8x128xi32>
    %143 = arith.andi %99, %142 : vector<8x128xi1>
    %cst_30 = arith.constant 0.000000e+00 : f32
    %144 = vector.broadcast %55 : f32 to vector<8x128xf32>
    %145 = vector.broadcast %cst_30 : f32 to vector<8x128xf32>
    %146 = arith.select %143, %144, %145 : vector<8x128xi1>, vector<8x128xf32>
    %147 = arith.addf %140, %146 : vector<8x128xf32>
    %c12_i32 = arith.constant 12 : i32
    %148 = vector.broadcast %c12_i32 : i32 to vector<8x128xi32>
    %149 = arith.cmpi eq, %96, %148 : vector<8x128xi32>
    %150 = arith.andi %99, %149 : vector<8x128xi1>
    %cst_31 = arith.constant 0.000000e+00 : f32
    %151 = vector.broadcast %71 : f32 to vector<8x128xf32>
    %152 = vector.broadcast %cst_31 : f32 to vector<8x128xf32>
    %153 = arith.select %150, %151, %152 : vector<8x128xi1>, vector<8x128xf32>
    %154 = arith.addf %147, %153 : vector<8x128xf32>
    %c13_i32 = arith.constant 13 : i32
    %155 = vector.broadcast %c13_i32 : i32 to vector<8x128xi32>
    %156 = arith.cmpi eq, %96, %155 : vector<8x128xi32>
    %157 = arith.andi %99, %156 : vector<8x128xi1>
    %cst_32 = arith.constant 0.000000e+00 : f32
    %158 = vector.broadcast %93 : f32 to vector<8x128xf32>
    %159 = vector.broadcast %cst_32 : f32 to vector<8x128xf32>
    %160 = arith.select %157, %158, %159 : vector<8x128xi1>, vector<8x128xf32>
    %161 = arith.addf %154, %160 : vector<8x128xf32>
    %c14_i32 = arith.constant 14 : i32
    %162 = vector.broadcast %c14_i32 : i32 to vector<8x128xi32>
    %163 = arith.cmpi eq, %96, %162 : vector<8x128xi32>
    %164 = arith.andi %99, %163 : vector<8x128xi1>
    %cst_33 = arith.constant 0.000000e+00 : f32
    %165 = vector.broadcast %95 : f32 to vector<8x128xf32>
    %166 = vector.broadcast %cst_33 : f32 to vector<8x128xf32>
    %167 = arith.select %164, %165, %166 : vector<8x128xi1>, vector<8x128xf32>
    %168 = arith.addf %161, %167 : vector<8x128xf32>
    %c0_34 = arith.constant 0 : index
    %c0_35 = arith.constant 0 : index
    %169 = vector.load %arg5[%c0_34, %c0_35] : memref<8x128xf32, #tpu.memory_space<vmem>>, vector<8x128xf32>
    tpu.vector_store %arg5[%c0_34, %c0_35], %168 {strides = array<i32>} : memref<8x128xf32, #tpu.memory_space<vmem>>, vector<8x128xf32>,
    return
  }
}

</mosaic_0001>

<bundles_post_ra>
// kernel: _fused_forward.1
= control target key start
LH: loop header
LB: loop body
LE: loop exit
PB: predicated region body
PF: predicated region fallthrough
CT: control target
= control target key end

     0   :  { %10 = vsyncpa [#allocation3], 0  ;;  %s396_s0 = inlined_call_operand.vmem [shape: f32[4], index: 0, kind: input, shape index: {}]   ;;  %s397_s1 = inlined_call_operand.vmem [shape: f32[2,128], index: 1, kind: input, shape index: {}]   ;;  %s398_s2 = inlined_call_operand.vmem [shape: f32[2,128], index: 2, kind: input, shape index: {}]   ;;  %s399_s3 = inlined_call_operand.vmem [shape: f32[8,128], index: 3, kind: input, shape index: {}]   ;;  %s400_s4 = inlined_call_operand.vmem [shape: s32[1,128], index: 4, kind: input, shape index: {}]   ;;  %s401_s5 = inlined_call_operand.vmem [shape: f32[8,128], index: 5, kind: output, shape index: {}]  }
   0x1   :  { %s17_s20 = sshll.u32 %s396_s0, 4  ;;  %s18_s20 = int_to_ptr.vmem [resolvable:$true] %s17_s20 }
   0x2   :  { %s271_s21 = scalar_lea.vmem %s18_s20, 16  ;;  %p276_p1 = scmp.lt.s32.totalorder %s18_s20, %s18_s20 }
   0x3   :  { %p272_p0 = scmp.ne.s32.totalorder %s18_s20, %s271_s21  ;;  %p277_p2 = scmp.lt.s32.totalorder %s271_s21, %s271_s21 }
   0x5   :  { %p278_p3 = por %p277_p2, %p276_p1 }
   0x7   :  { %p279_p4 = pnand %p278_p3, %p272_p0 }
   0x9   :  { %282 = shalt.err (!%p279_p4)
}
   0xa   :  { %s285_s22 = smov [#allocation2]  }
   0xb   :  { %20 = dma.vmem_to_smem %s18_s20, 16, %s285_s22, [#allocation3]  }
   0xc   :  { %283 = dma.done.wait [#allocation3], 16  }
   0xd   :  { %284 = vsyncadd [#allocation3], 4294967280 }
   0xe   :  { %32 = sfence }
   0xf   :  { %v37_v0 = vld [vmem:[%s397_s1] sm:$0x3]  ;;  %v74_v8 = vlaneseq  ;;  %vm43_vm0 = vcmask 1040384   ;;  %v286_v28 = vmov 0.0   ;;  %s287_s30 = smov 1.0   ;;  %s244_s7 = sld [smem:[#allocation2 + $0x2]] }
  0x10   :  { %v55_v1 = vld [vmem:[%s398_s2] sm:$0x3]  ;;  %v39_v3 = vrot.slane %v37_v0, 1  ;;  %s362_s8 = sld [smem:[#allocation2]]  ;;  %s245_s9 = sld [smem:[#allocation2 + $0x3]] }
  0x11   :  { %v72_v2 = vld [vmem:[%s399_s3] sm:$0xff]  ;;  %v57_v4 = vrot.slane %v55_v1, 1  ;;  %v332_v14 = vshrl.u32 %v74_v8, 7  ;;  %s243_s13 = sld [smem:[#allocation2 + $0x1]] }
  0x12   :  { %v76_v5 = vrot.slane %v72_v2, 4  ;;  %v41_v6 = vsub.f32 %v37_v0, %v39_v3  ;;  %v73_v20 = vld [vmem:[%s400_s4] sm:$0x1] }
  0x13   :  { %v59_v7 = vsub.f32 %v55_v1, %v57_v4  ;;  %v98_v19 = vsub.s32 0, %v332_v14  ;;  %vm93_vm6 = vcmp.ne.s32.totalorder %v73_v20, 8  ;;  %vm193_vm11 = vcmp.eq.s32.totalorder %v332_v14, 0 }
  0x14   :  { %v77_v9 = vmax.f32 %v72_v2, %v76_v5  ;;  %v42_v10 = vmul.f32 %v41_v6, %v41_v6  ;;  %v246_v53 = vsel %vm93_vm6, 1.0, %v286_v28 }
  0x15   :  { %v60_v11 = vmul.f32 %v59_v7, %v59_v7  ;;  %v99_v24 = vrot.slane %v73_v20, %v98_v19  ;;  %v169_v57 = vrot.slane %v246_v53, %v98_v19  ;;  %v122_v58 = vsel %vm43_vm0, %v246_v53, 0.0 }
  0x16   :  { %v78_v12 = vrot.slane %v77_v9, 2  ;;  %v44_v13 = vsel %vm43_vm0, %v42_v10, 0.0  ;;  %s185_s11 = ssub.f32 1.0, %s362_s8 }
  0x17   :  { %45 = vadd.xlane.f32.xlu0 %v44_v13  ;;  %v61_v16 = vsel %vm43_vm0, %v60_v11, 0.0  ;;  %vm100_vm3 = vcmp.eq.s32.totalorder %v332_v14, %v99_v24 }
  0x18   :  { %v79_v15 = vmax.f32 %v77_v9, %v78_v12  ;;  %v247_v29 = vsel %vm100_vm3, 1.0, %v286_v28 }
  0x19   :  { %v181_v61 = vmul.f32 %v247_v29, %v169_v57 }
  0x1a   :  { %v80_v17 = vrot.slane %v79_v15, 1 }
  0x1b   :  { %62 = vadd.xlane.f32.xlu0 %v61_v16 }
  0x1c   :  { %v81_v18 = vmax.f32 %v79_v15, %v80_v17 }
  0x1e   :  { %v82_v21 = vsub.f32 %v72_v2, %v81_v18  ;;  %vm137_vm1 = vcmp.eq.f32.partialorder %v72_v2, %v81_v18 }
  0x1f   :  { %v138_v22 = vsel %vm137_vm1, %v332_v14, 8 }
  0x20   :  { %v83_v23 = vmul.f32 1.442695, %v82_v21  ;;  %v139_v25 = vrot.slane %v138_v22, 4  ;;  %v103_v32 = vmul.f32 %v247_v29, %v82_v21 }
  0x22   :  { %265 = vpow2.f32 %v83_v23  ;;  %vm140_vm2 = vcmp.lt.s32.totalorder %v138_v22, %v139_v25  ;;  %v104_v36 = vrot.slane %v103_v32, 4 }
  0x23   :  { %v141_v26 = vsel %vm140_vm2, %v138_v22, %v139_v25 }
  0x24   :  { %v142_v27 = vrot.slane %v141_v26, 2  ;;  %v105_v43 = vadd.f32 %v104_v36, %v103_v32 }
  0x26   :  { %vm143_vm4 = vcmp.lt.s32.totalorder %v141_v26, %v142_v27  ;;  %v106_v46 = vrot.slane %v105_v43, 2 }
  0x27   :  { %v144_v30 = vsel %vm143_vm4, %v141_v26, %v142_v27 }
  0x28   :  { %v145_v31 = vrot.slane %v144_v30, 1  ;;  %v107_v48 = vadd.f32 %v106_v46, %v105_v43 }
  0x2a   :  { %vm146_vm5 = vcmp.lt.s32.totalorder %v144_v30, %v145_v31  ;;  %v108_v49 = vrot.slane %v107_v48, 1 }
  0x2b   :  { %v147_v33 = vsel %vm146_vm5, %v144_v30, %v145_v31  ;;  %v348_v30 = vand.u32 127, %v74_v8 }
  0x2c   :  { %v266_v34 = vpop.eup %265  ;;  %vm148_vm7 = vcmp.eq.s32.totalorder %v147_v33, %v73_v20  ;;  %v109_v50 = vadd.f32 %v108_v49, %v107_v48  ;;  %vm162_vm9 = vcmp.eq.s32.totalorder %v332_v14, %v147_v33 }
  0x2d   :  { %v85_v35 = vrot.slane %v266_v34, 4  ;;  %vm149_vm8 = vmand %vm148_vm7, %vm93_vm6  ;;  %v249_v59 = vsel %vm162_vm9, 1.0, %v286_v28  ;;  %vm217_vm10 = vcmp.eq.s32.totalorder %v348_v30, 11  ;;  %vm194_vm13 = vcmp.eq.s32.totalorder %v348_v30, 0 }
  0x2e   :  { %v248_v37 = vsel %vm149_vm8, 1.0, %v286_v28  ;;  %v171_v60 = vmul.f32 %v249_v59, %v169_v57  ;;  %vm218_vm12 = vmand %vm193_vm11, %vm217_vm10  ;;  %vm196_vm14 = vcmp.eq.s32.totalorder %v348_v30, 1  ;;  %vm199_vm15 = vcmp.eq.s32.totalorder %v348_v30, 2 }
  0x2f   :  { %v86_v38 = vadd.f32 %v266_v34, %v85_v35  ;;  %v152_v39 = vsel %vm43_vm0, %v248_v37, 0.0  ;;  %v177_v40 = vrot.slane %v248_v37, %v98_v19  ;;  %vm207_vm2 = vcmp.eq.s32.totalorder %v348_v30, 9 }
  0x30   :  { %153 = vadd.xlane.f32.xlu0 %v152_v39  ;;  %vm208_vm3 = vmand %vm193_vm11, %vm207_vm2  ;;  %vm212_vm4 = vcmp.eq.s32.totalorder %v348_v30, 10  ;;  %vm222_vm6 = vcmp.eq.s32.totalorder %v348_v30, 12  ;;  %vm227_vm7 = vcmp.eq.s32.totalorder %v348_v30, 13  ;;  %vm232_vm9 = vcmp.eq.s32.totalorder %v348_v30, 14 }
  0x31   :  { %v87_v41 = vrot.slane %v86_v38, 2  ;;  %v178_v42 = vmul.f32 %v247_v29, %v177_v40  ;;  %vm213_vm5 = vmand %vm193_vm11, %vm212_vm4 }
  0x32   :  { %vm223_vm8 = vmand %vm193_vm11, %vm222_vm6 }
  0x33   :  { %v88_v44 = vadd.f32 %v87_v41, %v86_v38  ;;  %vm228_vm10 = vmand %vm193_vm11, %vm227_vm7 }
  0x34   :  { %179 = vadd.xlane.f32.xlu0 %v178_v42 }
  0x35   :  { %v89_v45 = vrot.slane %v88_v44, 1 }
  0x37   :  { %v90_v47 = vadd.f32 %v89_v45, %v88_v44 }
  0x39   :  { %267 = vlog2.f32 %v90_v47 }
  0x43   :  { %v268_v51 = vpop.eup %267 }
  0x44   :  { %v92_v52 = vmul.f32 0.6931472, %v268_v51 }
  0x46   :  { %v110_v54 = vsub.f32 %v92_v52, %v109_v50 }
  0x48   :  { %v111_v55 = vmul.f32 %v246_v53, %v110_v54 }
  0x4a   :  { %v112_v56 = vsel %vm43_vm0, %v111_v55, 0.0  ;;  %vm202_vm0 = vcmp.eq.s32.totalorder %v348_v30, 8 }
  0x4b   :  { %113 = vadd.xlane.f32.xlu1 %v112_v56  ;;  %vm203_vm1 = vmand %vm193_vm11, %vm202_vm0 }
  0x4f   :  { %123 = vadd.xlane.f32.xlu1 %v122_v58 }
  0x53   :  { %172 = vadd.xlane.f32.xlu1 %v171_v60 }
  0x57   :  { %182 = vadd.xlane.f32.xlu1 %v181_v61 }
  0xa4   :  { %v46_v62 = vpop.xlane.xlu0 %45 }
  0xa5   :  { %v47_v63 = vrot.slane %v46_v62, 4 }
  0xa7   :  { %v48_v0 = vadd.f32 %v47_v63, %v46_v62 }
  0xa8   :  { %v63_v1 = vpop.xlane.xlu0 %62 }
  0xa9   :  { %v49_v2 = vrot.slane %v48_v0, 2  ;;  %v64_v3 = vrot.slane %v63_v1, 4 }
  0xab   :  { %v65_v4 = vadd.f32 %v64_v3, %v63_v1  ;;  %v50_v5 = vadd.f32 %v49_v2, %v48_v0 }
  0xad   :  { %v66_v6 = vrot.slane %v65_v4, 2  ;;  %v51_v7 = vrot.slane %v50_v5, 1 }
  0xaf   :  { %v52_v9 = vadd.f32 %v51_v7, %v50_v5  ;;  %v67_v10 = vadd.f32 %v66_v6, %v65_v4 }
  0xb1   :  { %250 = vpush %v52_v9  ;;  %v68_v11 = vrot.slane %v67_v10, 1 }
  0xb3   :  { %v69_v12 = vadd.f32 %v68_v11, %v67_v10 }
  0xb5   :  { %252 = vpush %v69_v12 }
  0xbd   :  { %v154_v28 = vpop.xlane.xlu0 %153 }
  0xbe   :  { %v155_v29 = vrot.slane %v154_v28, 4 }
  0xc0   :  { %v156_v31 = vadd.f32 %v155_v29, %v154_v28 }
  0xc1   :  { %v180_v40 = vpop.xlane.xlu0 %179 }
  0xc2   :  { %v157_v32 = vrot.slane %v156_v31, 2  ;;  %v197_v42 = vsel %vm196_vm14, %v180_v40, 0.0 }
  0xc4   :  { %v158_v35 = vadd.f32 %v157_v32, %v156_v31 }
  0xc6   :  { %v159_v36 = vrot.slane %v158_v35, 1 }
  0xc8   :  { %v160_v37 = vadd.f32 %v159_v36, %v158_v35 }
  0xd8   :  { %v114_v13 = vpop.xlane.xlu1 %113 }
  0xd9   :  { %v115_v15 = vrot.slane %v114_v13, 4 }
  0xdb   :  { %v116_v16 = vadd.f32 %v115_v15, %v114_v13 }
  0xdc   :  { %v124_v17 = vpop.xlane.xlu1 %123 }
  0xdd   :  { %v117_v18 = vrot.slane %v116_v16, 2  ;;  %v125_v19 = vrot.slane %v124_v17, 4 }
  0xdf   :  { %v126_v20 = vadd.f32 %v125_v19, %v124_v17  ;;  %v118_v21 = vadd.f32 %v117_v18, %v116_v16 }
  0xe0   :  { %v173_v39 = vpop.xlane.xlu1 %172 }
  0xe1   :  { %v127_v22 = vrot.slane %v126_v20, 2  ;;  %v119_v23 = vrot.slane %v118_v21, 1  ;;  %v195_v41 = vsel %vm194_vm13, %v173_v39, 0.0 }
  0xe2   :  { %s350_s3 = spop %250  ;;  %v198_v44 = vadd.f32 %v197_v42, %v195_v41 }
  0xe3   :  { %v120_v24 = vadd.f32 %v119_v23, %v118_v21  ;;  %v128_v25 = vadd.f32 %v127_v22, %v126_v20  ;;  %s365_s10 = smul.f32 %s350_s3, %s244_s7 }
  0xe4   :  { %v183_v43 = vpop.xlane.xlu1 %182 }
  0xe5   :  { %254 = vpush %v120_v24  ;;  %v129_v26 = vrot.slane %v128_v25, 1  ;;  %v200_v45 = vsel %vm199_vm15, %v183_v43, 0.0  ;;  %v204_v46 = vstv %s365_s10  ;;  %s184_s14 = smul.f32 %s365_s10, %s362_s8 }
  0xe6   :  { %s353_s4 = spop %252  ;;  %v201_v47 = vadd.f32 %v200_v45, %v198_v44  ;;  %v205_v48 = vsel %vm203_vm1, %v204_v46, 0.0 }
  0xe7   :  { %v130_v27 = vadd.f32 %v129_v26, %v128_v25  ;;  %s71_s12 = smul.f32 %s353_s4, %s245_s9 }
  0xe8   :  { %v206_v50 = vadd.f32 %v205_v48, %v201_v47 }
  0xe9   :  { %256 = vpush %v130_v27  ;;  %v209_v49 = vstv %s71_s12  ;;  %s186_s15 = smul.f32 %s185_s11, %s71_s12 }
  0xea   :  { %v210_v51 = vsel %vm208_vm3, %v209_v49, 0.0 }
  0xeb   :  { %s187_s19 = sadd.f32 %s186_s15, %s184_s14  ;;  %v211_v52 = vadd.f32 %v210_v51, %v206_v50 }
 0x116   :  { %s356_s28 = spop %254 }
 0x11a   :  { %s257_s29 = spop %256 }
 0x11b   :  { %s132_s6 = smax.f32 %s287_s30, %s257_s29  ;;  %v219_v8 = vstv %s257_s29 }
 0x11c   :  { %v133_v33 = vstv %s132_s6  ;;  %v220_v34 = vsel %vm218_vm12, %v219_v8, 0.0  ;;  %vm233_vm12 = vmand %vm193_vm11, %vm232_vm9 }
 0x11d   :  { %269 = vrcp.f32 %v133_v33 }
 0x127   :  { %v270_v38 = vpop.eup %269 }
 0x128   :  { %258 = vpush %v270_v38 }
 0x129   :  { %260 = vpush %v160_v37 }
 0x159   :  { %s259_s16 = spop %258 }
 0x15a   :  { %s136_s17 = smul.f32 %s259_s16, %s356_s28  ;;  %s261_s18 = spop %260 }
 0x15b   :  { %v224_v56 = vstv %s261_s18 }
 0x15c   :  { %s188_s20 = smul.f32 %s243_s13, %s136_s17  ;;  %v214_v53 = vstv %s136_s17  ;;  %v225_v59 = vsel %vm223_vm8, %v224_v56, 0.0 }
 0x15d   :  { %v215_v54 = vsel %vm213_vm5, %v214_v53, 0.0 }
 0x15e   :  { %s189_s21 = sadd.f32 %s188_s20, %s187_s19  ;;  %v216_v55 = vadd.f32 %v215_v54, %v211_v52 }
 0x15f   :  { %s190_s22 = sadd.f32 %s188_s20, %s365_s10 }
 0x160   :  { %v229_v57 = vstv %s189_s21  ;;  %v221_v58 = vadd.f32 %v220_v34, %v216_v55 }
 0x161   :  { %v234_v60 = vstv %s190_s22  ;;  %v230_v62 = vsel %vm228_vm10, %v229_v57, 0.0 }
 0x162   :  { %v226_v61 = vadd.f32 %v225_v59, %v221_v58  ;;  %v235_v0 = vsel %vm233_vm12, %v234_v60, 0.0 }
 0x164   :  { %v231_v63 = vadd.f32 %v230_v62, %v226_v61 }
 0x166   :  { %v236_v1 = vadd.f32 %v235_v0, %v231_v63 }
 0x168   :  { %237 = vst [vmem:[%s401_s5] sm:$0xff] %v236_v1 }
 0x169   :  { %242 = vsyncpa [#allocation3], 1 }

</bundles_post_ra>
